<compile_context>
chip_gen: v7x
topology: tpu7x:2x2x1
jax: 0.10.0
libtpu: 0.0.40
codegen_flags: <defaults>
</compile_context>

<pallas_src>
import functools

import jax
import jax.numpy as jnp
from jax.experimental import pallas as pl
from jax.experimental.pallas import tpu as pltpu

EPS = 1e-8


def _switching_loss_kernel(preds_ref, gt_ref, out_ref, *, eps):
    T = preds_ref.shape[-1]
    p = preds_ref[...].astype(jnp.float32)                 # (TB, T)

    prev = p[:, : T - 1]                                   # start-0 slice: lane-aligned, cheap
    if T % 128 == 0:
        # p[:, t+1] via a circular lane roll (XLU) then a start-0 slice.
        # roll(x, T-1) == roll(x, -1):  nxt[:, t] = p[:, (t+1) % T].
        nxt = pltpu.roll(p, shift=T - 1, axis=1)[:, : T - 1]
    else:
        # Unaligned T: fall back to the plain offset-1 slice (one relayout copy).
        nxt = p[:, 1:]

    d = jnp.abs(nxt - prev)                                # (TB, T-1)
    # diff / (diff + eps) with the divide moved off the VALU onto the EUP.
    s = d * pl.reciprocal(d + eps, approx=False)

    gt = gt_ref[...].astype(jnp.float32)                   # (TB, T-1)
    # gt*(s-1)^2 + (1-gt)*s^2  ==  s^2 - 2*gt*s + gt
    loss = s * (s - 2.0 * gt) + gt
    out_ref[...] = jnp.sum(loss, axis=1, keepdims=True)    # (TB, 1)


def _pick_batch_tile(B, T, preds_itemsize, gt_itemsize):
    # Largest batch tile whose double-buffered input tiles fit a ~24 MiB budget
    # (conservative for v7x's 64 MiB VMEM; fine on v5e/v6e 128 MiB).
    budget = 24 * 1024 * 1024
    row_bytes = 2 * (T * preds_itemsize + (T - 1) * gt_itemsize) + 2 * 4
    tb = budget // max(row_bytes, 1)
    if tb >= B:
        return B                       # one tile covers the whole batch
    return max(8, (tb // 8) * 8)       # sublane constraint: multiple of 8


def switching_loss(preds_indices, gt_switch, *, eps=EPS, batch_tile=None):
    B, T = preds_indices.shape
    assert gt_switch.shape == (B, T - 1)
    if batch_tile is None:
        batch_tile = _pick_batch_tile(
            B, T, preds_indices.dtype.itemsize, gt_switch.dtype.itemsize)

    grid = (pl.cdiv(B, batch_tile),)
    out = pl.pallas_call(
        functools.partial(_switching_loss_kernel, eps=eps),
        out_shape=jax.ShapeDtypeStruct((B, 1), jnp.float32),
        grid=grid,
        in_specs=[
            pl.BlockSpec((batch_tile, T), lambda i: (i, 0)),
            pl.BlockSpec((batch_tile, T - 1), lambda i: (i, 0)),
        ],
        out_specs=pl.BlockSpec((batch_tile, 1), lambda i: (i, 0)),
        compiler_params=pltpu.CompilerParams(
            dimension_semantics=("parallel",),     # batch tiles shard across v7x TCs
            vmem_limit_bytes=48 * 1024 * 1024,     # room for big double-buffered tiles
        ),
    )(preds_indices, gt_switch)
    return out[:, 0]                               # (B,), matches torch


def switching_loss_ref(preds_indices, gt_switch):
    prev = preds_indices[:, :-1]
    nxt = preds_indices[:, 1:]
    diff = jnp.abs(nxt - prev)
    switched = diff / (diff + EPS)
    loss = gt_switch * (switched - 1.0) ** 2 + (1.0 - gt_switch) * switched ** 2
    return loss.sum(axis=1)


if __name__ == "__main__":
    key = jax.random.PRNGKey(0)
    k1, k2 = jax.random.split(key)
    B, T = 8, 128                                  # gt_switch is (8, 127)
    # preds_indices: continuous "index" predictions
    preds_indices = jax.random.uniform(k1, (B, T), dtype=jnp.float32) * 10.0
    # gt_switch: binary ground-truth switch labels; bf16 is exact for {0, 1}
    # and halves the gt HBM traffic for this memory-bound kernel.
    gt_f32 = (jax.random.uniform(k2, (B, T - 1)) > 0.5).astype(jnp.float32)
    gt_switch = gt_f32.astype(jnp.bfloat16)

    out = switching_loss(preds_indices, gt_switch)
    jax.block_until_ready(out)

    ref = switching_loss_ref(preds_indices, gt_f32)
    assert out.shape == (B,)
    assert jnp.allclose(out, ref, rtol=1e-5, atol=1e-5), (out, ref)

    print("KERNEL_OK")
</pallas_src>

<mosaic_0001>
module attributes {stable_mosaic.version = 11 : i64} {
  func.func @_switching_loss_kernel(%arg0: i32, %arg1: memref<8x128xf32, #tpu.memory_space<vmem>>, %arg2: memref<8x127xbf16, #tpu.memory_space<vmem>>, %arg3: memref<8x1xf32, #tpu.memory_space<vmem>>) attributes {dimension_semantics = [#tpu.dimension_semantics<parallel>], iteration_bounds = array<i64: 1>, scalar_prefetch = 0 : i64, scratch_operands = 0 : i64, tpu.core_type = #tpu.core_type<tc>, window_params = [{transform_indices = @transform_0, window_bounds = array<i64: 8, 128>}, {transform_indices = @transform_1, window_bounds = array<i64: 8, 127>}, {transform_indices = @transform_2, window_bounds = array<i64: 8, 1>}]} {
    %c0 = arith.constant 0 : index
    %c0_0 = arith.constant 0 : index
    %0 = vector.load %arg1[%c0, %c0_0] : memref<8x128xf32, #tpu.memory_space<vmem>>, vector<8x128xf32>
    %1 = vector.extract_strided_slice %0 {offsets = [0, 0], sizes = [8, 127], strides = [1, 1]} : vector<8x128xf32> to vector<8x127xf32>
    %c127_i32 = arith.constant 127 : i32
    %2 = tpu.dynamic_rotate %0 by %c127_i32 dim 1 : vector<8x128xf32>, i32 -> vector<8x128xf32>
    %3 = vector.extract_strided_slice %2 {offsets = [0, 0], sizes = [8, 127], strides = [1, 1]} : vector<8x128xf32> to vector<8x127xf32>
    %4 = arith.subf %3, %1 : vector<8x127xf32>
    %5 = math.absf %4 : vector<8x127xf32>
    %cst = arith.constant 9.99999993E-9 : f32
    %6 = vector.broadcast %cst : f32 to vector<8x127xf32>
    %7 = arith.addf %5, %6 : vector<8x127xf32>
    %8 = tpu.reciprocal %7 : vector<8x127xf32> -> vector<8x127xf32>
    %9 = arith.mulf %5, %8 : vector<8x127xf32>
    %c0_1 = arith.constant 0 : index
    %c0_2 = arith.constant 0 : index
    %10 = vector.load %arg2[%c0_1, %c0_2] : memref<8x127xbf16, #tpu.memory_space<vmem>>, vector<8x127xbf16>
    %11 = arith.extf %10 : vector<8x127xbf16> to vector<8x127xf32>
    %cst_3 = arith.constant 2.000000e+00 : f32
    %12 = vector.broadcast %cst_3 : f32 to vector<8x127xf32>
    %13 = arith.mulf %12, %11 : vector<8x127xf32>
    %14 = arith.subf %9, %13 : vector<8x127xf32>
    %15 = arith.mulf %9, %14 : vector<8x127xf32>
    %16 = arith.addf %15, %11 : vector<8x127xf32>
    %cst_4 = arith.constant dense<0.000000e+00> : vector<8xf32>
    %17 = vector.multi_reduction <add>, %16, %cst_4 [1] : vector<8x127xf32> to vector<8xf32>
    %18 = vector.shape_cast %17 : vector<8xf32> to vector<8x1xf32>
    %c0_5 = arith.constant 0 : index
    %c0_6 = arith.constant 0 : index
    %19 = vector.load %arg3[%c0_5, %c0_6] : memref<8x1xf32, #tpu.memory_space<vmem>>, vector<8x1xf32>
    tpu.vector_store %arg3[%c0_5, %c0_6], %18 {strides = array<i32>} : memref<8x1xf32, #tpu.memory_space<vmem>>, vector<8x1xf32>,
    return
  }
  func.func @transform_0(%arg0: i32) -> (i32, i32) {
    %c0_i32 = arith.constant 0 : i32
    %c0_i32_0 = arith.constant 0 : i32
    return %arg0, %c0_i32 : i32, i32
  }
  func.func @transform_1(%arg0: i32) -> (i32, i32) {
    %c0_i32 = arith.constant 0 : i32
    %c0_i32_0 = arith.constant 0 : i32
    return %arg0, %c0_i32 : i32, i32
  }
  func.func @transform_2(%arg0: i32) -> (i32, i32) {
    %c0_i32 = arith.constant 0 : i32
    %c0_i32_0 = arith.constant 0 : i32
    return %arg0, %c0_i32 : i32, i32
  }
}

</mosaic_0001>

<bundles_post_ra>
// kernel: tpu_custom_call.1
= control target key start
LH: loop header
LB: loop body
LE: loop exit
PB: predicated region body
PF: predicated region fallthrough
CT: control target
= control target key end

     0   :  { %7 = vsyncpa [#allocation3], 0  ;;  %s159_s0 = inlined_call_operand.hbm [shape: f32[8,128], index: 0, kind: input, shape index: {}]   ;;  %s160_s1 = inlined_call_operand.hbm [shape: bf16[8,127], index: 1, kind: input, shape index: {}]   ;;  %s161_s2 = inlined_call_operand.vmem [shape: f32[8,1], index: 2, kind: output, shape index: {}]  }
   0x1   :  { %8 = vsyncpa [#allocation5], 0  ;;  %s114_s9 = smov [#allocation2]   ;;  %s115_s11 = smov [#allocation4]  }
   0x2   :  { %s15_s10 = sshll.u32 %s114_s9, 4  ;;  %s25_s12 = sshll.u32 %s115_s11, 4  ;;  %s16_s10 = int_to_ptr.vmem [resolvable:$true] %s15_s10  ;;  %s26_s12 = int_to_ptr.vmem [resolvable:$true] %s25_s12 }
   0x3   :  { %s66_s15 = scalar_lea.hbm %s159_s0, 128 }
   0x4   :  { %p67_p0 = scmp.ne.s32.totalorder %s159_s0, %s66_s15  ;;  %p70_p1 = scmp.lt.u32.totalorder %s66_s15, %s159_s0 }
   0x6   :  { %p72_p2 = pnand %p70_p1, %p67_p0 }
   0x8   :  { %75 = shalt.err (!%p72_p2)
}
   0x9   :  { %s76_s20 = scalar_lea.vmem %s16_s10, 128  ;;  %p81_p4 = scmp.lt.s32.totalorder %s16_s10, %s16_s10 }
   0xa   :  { %p77_p3 = scmp.ne.s32.totalorder %s16_s10, %s76_s20  ;;  %p82_p5 = scmp.lt.s32.totalorder %s76_s20, %s76_s20 }
   0xc   :  { %p83_p6 = por %p82_p5, %p81_p4 }
   0xe   :  { %p84_p7 = pnand %p83_p6, %p77_p3 }
  0x10   :  { %87 = shalt.err (!%p84_p7)
}
  0x11   :  { %18 = dma.hbm_to_vmem [thread:$0]  %s159_s0, 128, %s16_s10, [#allocation3]  }
  0x12   :  { %s88_s25 = scalar_lea.hbm %s160_s1, 64 }
  0x13   :  { %p89_p8 = scmp.ne.s32.totalorder %s160_s1, %s88_s25  ;;  %p92_p9 = scmp.lt.u32.totalorder %s88_s25, %s160_s1 }
  0x15   :  { %p94_p10 = pnand %p92_p9, %p89_p8 }
  0x17   :  { %97 = shalt.err (!%p94_p10)
}
  0x18   :  { %s98_s30 = scalar_lea.vmem %s26_s12, 64  ;;  %p103_p12 = scmp.lt.s32.totalorder %s26_s12, %s26_s12 }
  0x19   :  { %p99_p11 = scmp.ne.s32.totalorder %s26_s12, %s98_s30  ;;  %p104_p13 = scmp.lt.s32.totalorder %s98_s30, %s98_s30 }
  0x1b   :  { %p105_p0 = por %p104_p13, %p103_p12 }
  0x1d   :  { %p106_p1 = pnand %p105_p0, %p99_p11 }
  0x1f   :  { %109 = shalt.err (!%p106_p1)
}
  0x20   :  { %28 = dma.hbm_to_vmem [thread:$0]  %s160_s1, 64, %s26_s12, [#allocation5]  }
  0x21   :  { %110 = dma.done.wait [#allocation3], 128  }
  0x22   :  { %111 = vsyncadd [#allocation3], 4294967168 }
  0x23   :  { %112 = dma.done.wait [#allocation5], 64  }
  0x24   :  { %113 = vsyncadd [#allocation5], 4294967232  ;;  %v35_v0 = vld [vmem:[#allocation2] sm:$0xff]  ;;  %s116_s4 = smov 127   ;;  %v43_v5 = vld [vmem:[#allocation4] sm:$0xf] }
  0x25   :  { %36 = vrot.lane.b32.xlu0 %v35_v0, %s116_s4  ;;  %v44_v6 = vunpack.c.l.bf16 %v43_v5  ;;  %vm49_vm0 = vcmask 1039360   ;;  %vm53_vm1 = vcmask 7168  }
  0x27   :  { %v45_v7 = vmul.f32 2.0, %v44_v6 }
  0x97   :  { %v37_v1 = vpop.permute.xlu0 %36 }
  0x98   :  { %v38_v2 = vsub.f32 %v37_v1, %v35_v0 }
  0x9a   :  { %v39_v3 = vand.u32 2147483647, %v38_v2 }
  0x9c   :  { %v40_v4 = vadd.f32 1e-08, %v39_v3 }
  0x9e   :  { %64 = vrcp.f32 %v40_v4 }
  0xa8   :  { %v65_v8 = vpop.eup %64 }
  0xa9   :  { %v42_v9 = vmul.f32 %v65_v8, %v39_v3 }
  0xab   :  { %v46_v10 = vsub.f32 %v42_v9, %v45_v7 }
  0xad   :  { %v47_v11 = vmul.f32 %v46_v10, %v42_v9 }
  0xaf   :  { %v48_v12 = vadd.f32 %v47_v11, %v44_v6 }
  0xb1   :  { %v50_v13 = vsel %vm49_vm0, %v48_v12, 0.0 }
  0xb2   :  { %51 = vadd.xlane.f32.xlu0 %v50_v13 }
 0x13f   :  { %v52_v14 = vpop.xlane.xlu0 %51 }
 0x140   :  { %54 = vst.msk [vmem:[%s161_s2] sm:$0xff] %vm53_vm1, %v52_v14 }
 0x141   :  { %59 = vsyncpa [#allocation3], 1 }
 0x142   :  { %60 = vsyncpa [#allocation5], 1 }

</bundles_post_ra>
